<compile_context>
chip_gen: v7x
topology: tpu7x:2x2x1
jax: 0.10.0
libtpu: 0.0.40
codegen_flags: <defaults>
</compile_context>

<pallas_src>
import math

import jax
import jax.numpy as jnp
from jax.experimental import pallas as pl
from jax.experimental.pallas import tpu as pltpu

BATCH = 2
SEQ = 8
HIDDEN = 32
NUM_HEADS = 4
HEAD_DIM = HIDDEN // NUM_HEADS
FF = 4 * HIDDEN
EPS = 1e-5  # PyTorch LayerNorm default
ROWS = BATCH * SEQ

# ---- packed parameter slab layout -------------------------------------------
# Rows 0:HIDDEN  -> weight columns: [Wqkv(96) | Wo(32) | W1(128) | W2^T(128) | Wskip(32)]
# Rows HIDDEN:.. -> one bias/gain vector per row (lane-padded to SLAB_COLS).
_C_QKV0, _C_QKV1 = 0, 3 * HIDDEN                      # 0:96   fused Wq|Wk|Wv (Wq pre-scaled)
_C_WO0, _C_WO1 = 3 * HIDDEN, 4 * HIDDEN               # 96:128 attn out proj
_C_W10, _C_W11 = 4 * HIDDEN, 4 * HIDDEN + FF          # 128:256 ff w1
_C_W2T0, _C_W2T1 = 4 * HIDDEN + FF, 4 * HIDDEN + 2 * FF  # 256:384 ff w2 (transposed)
_C_WS0, _C_WS1 = 4 * HIDDEN + 2 * FF, 5 * HIDDEN + 2 * FF  # 384:416 skip proj
SLAB_COLS = 5 * HIDDEN + 2 * FF                       # 416

_R_LN1G, _R_LN1B = 0, 1
_R_BQKV = 2
_R_BO = 3
_R_LN2G, _R_LN2B = 4, 5
_R_B1 = 6
_R_B2 = 7
_R_BSKIP = 8
_R_LNSG, _R_LNSB = 9, 10
_VEC_ROWS = 16
SLAB_ROWS = HIDDEN + _VEC_ROWS                        # 48 (multiple of 8 sublanes)

# dot_general "NT" dimension numbers: contract last dim of both operands (a @ b^T)
_NT = (((1,), (1,)), ((), ()))


def _layernorm(v, g, b):
    mu = jnp.mean(v, axis=-1, keepdims=True)
    var = jnp.mean(jnp.square(v - mu), axis=-1, keepdims=True)
    return (v - mu) * jax.lax.rsqrt(var + EPS) * g + b


def _gelu_exact(v):
    # nn.GELU() default: exact erf-based GELU
    return 0.5 * v * (1.0 + jax.lax.erf(v * 0.7071067811865476))


def transformer_layer_kernel(x_ref, p_ref, out_ref):
    x = x_ref[...].astype(jnp.float32)                       # (ROWS, H)

    # ---- static views into the packed parameter slab (free) ----
    wqkv = p_ref[0:HIDDEN, _C_QKV0:_C_QKV1]                  # (H, 3H)
    wo = p_ref[0:HIDDEN, _C_WO0:_C_WO1]                      # (H, H)
    w1 = p_ref[0:HIDDEN, _C_W10:_C_W11]                      # (H, FF)
    w2t = p_ref[0:HIDDEN, _C_W2T0:_C_W2T1]                   # (H, FF)  == W2^T
    wskip = p_ref[0:HIDDEN, _C_WS0:_C_WS1]                   # (H, H)

    def vrow(r, width):
        return p_ref[HIDDEN + r:HIDDEN + r + 1, 0:width]     # (1, width)

    ln1_g = vrow(_R_LN1G, HIDDEN)
    ln1_b = vrow(_R_LN1B, HIDDEN)
    bqkv = vrow(_R_BQKV, 3 * HIDDEN)
    bo = vrow(_R_BO, HIDDEN)
    ln2_g = vrow(_R_LN2G, HIDDEN)
    ln2_b = vrow(_R_LN2B, HIDDEN)
    b1 = vrow(_R_B1, FF)
    b2 = vrow(_R_B2, HIDDEN)
    bskip = vrow(_R_BSKIP, HIDDEN)
    lns_g = vrow(_R_LNSG, HIDDEN)
    lns_b = vrow(_R_LNSB, HIDDEN)

    # ---- norm1 + fused QKV projection (1/sqrt(d) folded into Q columns) ----
    xn = _layernorm(x, ln1_g, ln1_b)
    qkv = jnp.dot(xn, wqkv, preferred_element_type=jnp.float32) + bqkv  # (ROWS, 3H)

    # ---- block-diagonal mask killing cross-batch attention (built once, VPU) ----
    rb = jax.lax.broadcasted_iota(jnp.int32, (ROWS, ROWS), 0)
    cb = jax.lax.broadcasted_iota(jnp.int32, (ROWS, ROWS), 1)
    same_batch = jnp.zeros((ROWS, ROWS), dtype=jnp.bool_)
    for b in range(BATCH):
        lo, hi = b * SEQ, (b + 1) * SEQ
        same_batch = same_batch | (
            ((rb >= lo) & (rb < hi)) & ((cb >= lo) & (cb < hi)))
    neg_mask = jnp.where(same_batch, 0.0, -1e30).astype(jnp.float32)

    # ---- multi-head self-attention: per-head 2-D matmuls over both batches ----
    ctx_heads = []
    for h in range(NUM_HEADS):
        c0 = h * HEAD_DIM
        qh = qkv[:, c0:c0 + HEAD_DIM]                               # (ROWS, d)
        kh = qkv[:, HIDDEN + c0:HIDDEN + c0 + HEAD_DIM]             # (ROWS, d)
        vh = qkv[:, 2 * HIDDEN + c0:2 * HIDDEN + c0 + HEAD_DIM]     # (ROWS, d)

        s = jax.lax.dot_general(qh, kh, _NT,
                                preferred_element_type=jnp.float32)  # (ROWS, ROWS)
        s = s + neg_mask
        s = s - jnp.max(s, axis=-1, keepdims=True)
        p = jnp.exp(s)
        p = p * pl.reciprocal(jnp.sum(p, axis=-1, keepdims=True), approx=False)
        ctx_heads.append(jnp.dot(p, vh, preferred_element_type=jnp.float32))
    ctx_all = jnp.concatenate(ctx_heads, axis=1)                     # (ROWS, H)

    attn = jnp.dot(ctx_all, wo, preferred_element_type=jnp.float32) + bo
    x1 = x + attn                                            # dropout == identity (eval)

    # ---- norm2 + feedforward + residual ----
    x2n = _layernorm(x1, ln2_g, ln2_b)
    hdn = _gelu_exact(jnp.dot(x2n, w1, preferred_element_type=jnp.float32) + b1)
    ff = jax.lax.dot_general(hdn, w2t, _NT,
                             preferred_element_type=jnp.float32) + b2
    x2 = x1 + ff

    # ---- skip projection + skip norm ----
    sk = jnp.dot(x2, wskip, preferred_element_type=jnp.float32) + bskip
    skip = _layernorm(sk, lns_g, lns_b)

    # ---- single merged output slab: [x2 ; skip] along sublanes ----
    out_ref[...] = jnp.concatenate([x2, skip], axis=0).astype(out_ref.dtype)


def pack_params(params):
    """Host-side packing of the 20 raw parameters into one (48, 416) slab."""
    (ln1_g, ln1_b, wq, wk, wv, bq, bk, bv, wo, bo,
     ln2_g, ln2_b, w1, b1, w2, b2, wskip, bskip, lns_g, lns_b) = params

    scale = 1.0 / math.sqrt(HEAD_DIM)
    wqkv = jnp.concatenate([wq * scale, wk, wv], axis=1)      # (H, 3H)
    bqkv = jnp.concatenate([bq * scale, bk, bv], axis=1)      # (1, 3H)

    wrows = jnp.concatenate([wqkv, wo, w1, w2.T, wskip], axis=1)  # (32, 416)

    def row(v):
        v = v.reshape(-1).astype(jnp.float32)
        return jnp.pad(v, (0, SLAB_COLS - v.shape[0]))

    vec_rows = [ln1_g, ln1_b, bqkv, bo, ln2_g, ln2_b, b1, b2, bskip, lns_g, lns_b]
    vec = jnp.stack(
        [row(v) for v in vec_rows]
        + [jnp.zeros((SLAB_COLS,), jnp.float32)] * (_VEC_ROWS - len(vec_rows)))
    return jnp.concatenate([wrows.astype(jnp.float32), vec], axis=0)  # (48, 416)


def transformer_layer(x, param_slab):
    B, S, H = x.shape
    x2d = x.reshape(B * S, H)                                 # free wrapper-side reshape
    out = pl.pallas_call(
        transformer_layer_kernel,
        out_shape=jax.ShapeDtypeStruct((2 * B * S, H), jnp.float32),
        in_specs=[pl.BlockSpec(memory_space=pltpu.MemorySpace.VMEM),
                  pl.BlockSpec(memory_space=pltpu.MemorySpace.VMEM)],
        out_specs=pl.BlockSpec(memory_space=pltpu.MemorySpace.VMEM),
        cost_estimate=pl.CostEstimate(flops=500_000,
                                      transcendentals=4_000,
                                      bytes_accessed=96_000),
    )(x2d, param_slab)
    x_out = out[:B * S].reshape(B, S, H)
    skip_out = out[B * S:].reshape(B, S, H)
    return x_out, skip_out


def make_params(key):
    ks = jax.random.split(key, 12)

    def randn(k, shape, scale=0.05):
        return (scale * jax.random.normal(k, shape)).astype(jnp.float32)

    params = [
        jnp.ones((1, HIDDEN), jnp.float32),            # ln1 gamma
        jnp.zeros((1, HIDDEN), jnp.float32),           # ln1 beta
        randn(ks[0], (HIDDEN, HIDDEN)),                # wq  (in, out)
        randn(ks[1], (HIDDEN, HIDDEN)),                # wk
        randn(ks[2], (HIDDEN, HIDDEN)),                # wv
        randn(ks[3], (1, HIDDEN)),                     # bq
        randn(ks[4], (1, HIDDEN)),                     # bk
        randn(ks[5], (1, HIDDEN)),                     # bv
        randn(ks[6], (HIDDEN, HIDDEN)),                # wo (attn out proj)
        randn(ks[7], (1, HIDDEN)),                     # bo
        jnp.ones((1, HIDDEN), jnp.float32),            # ln2 gamma
        jnp.zeros((1, HIDDEN), jnp.float32),           # ln2 beta
        randn(ks[8], (HIDDEN, FF)),                    # ff w1
        randn(ks[9], (1, FF)),                         # ff b1
        randn(ks[10], (FF, HIDDEN)),                   # ff w2
        randn(ks[11], (1, HIDDEN)),                    # ff b2
        randn(jax.random.fold_in(key, 100), (HIDDEN, HIDDEN)),  # skip_proj w
        randn(jax.random.fold_in(key, 101), (1, HIDDEN)),       # skip_proj b
        jnp.ones((1, HIDDEN), jnp.float32),            # skip_norm gamma
        jnp.zeros((1, HIDDEN), jnp.float32),           # skip_norm beta
    ]
    return params


def reference(x, params):
    (ln1_g, ln1_b, wq, wk, wv, bq, bk, bv, wo, bo,
     ln2_g, ln2_b, w1, b1, w2, b2, wskip, bskip, lns_g, lns_b) = params

    def ln(v, g, b):
        mu = v.mean(-1, keepdims=True)
        var = ((v - mu) ** 2).mean(-1, keepdims=True)
        return (v - mu) / jnp.sqrt(var + EPS) * g + b

    B, S, H = x.shape
    xn = ln(x, ln1_g, ln1_b)
    q = (xn @ wq + bq).reshape(B, S, NUM_HEADS, HEAD_DIM)
    k = (xn @ wk + bk).reshape(B, S, NUM_HEADS, HEAD_DIM)
    v = (xn @ wv + bv).reshape(B, S, NUM_HEADS, HEAD_DIM)
    s = jnp.einsum("bqhd,bkhd->bhqk", q, k) / math.sqrt(HEAD_DIM)
    p = jax.nn.softmax(s, axis=-1)
    ctx = jnp.einsum("bhqk,bkhd->bqhd", p, v).reshape(B, S, H)
    attn = ctx @ wo + bo
    x1 = x + attn
    x2n = ln(x1, ln2_g, ln2_b)
    hdn = x2n @ w1 + b1
    hdn = 0.5 * hdn * (1.0 + jax.lax.erf(hdn / jnp.sqrt(2.0)))
    x2 = x1 + (hdn @ w2 + b2)
    skip = ln(x2 @ wskip + bskip, lns_g, lns_b)
    return x2, skip


if __name__ == "__main__":
    key = jax.random.PRNGKey(0)
    kx, kp = jax.random.split(key)
    x = jax.random.normal(kx, (BATCH, SEQ, HIDDEN), jnp.float32)
    params = make_params(kp)
    param_slab = pack_params(params)

    out_x, out_skip = jax.block_until_ready(transformer_layer(x, param_slab))

    ref_x, ref_skip = reference(x, params)
    assert jnp.allclose(out_x, ref_x, atol=2e-3, rtol=2e-3)
    assert jnp.allclose(out_skip, ref_skip, atol=2e-3, rtol=2e-3)

    print("KERNEL_OK")
</pallas_src>

<mosaic_0001>
module attributes {stable_mosaic.version = 11 : i64} {
  func.func @transformer_layer_kernel(%arg0: memref<16x32xf32, #tpu.memory_space<vmem>>, %arg1: memref<48x416xf32, #tpu.memory_space<vmem>>, %arg2: memref<32x32xf32, #tpu.memory_space<vmem>>) attributes {dimension_semantics = [], scalar_prefetch = 0 : i64, scratch_operands = 0 : i64, tpu.core_type = #tpu.core_type<tc>} {
    %c0 = arith.constant 0 : index
    %c0_0 = arith.constant 0 : index
    %0 = vector.load %arg0[%c0, %c0_0] : memref<16x32xf32, #tpu.memory_space<vmem>>, vector<16x32xf32>
    %c0_1 = arith.constant 0 : index
    %c0_2 = arith.constant 0 : index
    %1 = vector.load %arg1[%c0_1, %c0_2] : memref<48x416xf32, #tpu.memory_space<vmem>>, vector<32x96xf32>
    %c0_3 = arith.constant 0 : index
    %c96 = arith.constant 96 : index
    %2 = vector.load %arg1[%c0_3, %c96] : memref<48x416xf32, #tpu.memory_space<vmem>>, vector<32x32xf32>
    %c0_4 = arith.constant 0 : index
    %c128 = arith.constant 128 : index
    %3 = vector.load %arg1[%c0_4, %c128] : memref<48x416xf32, #tpu.memory_space<vmem>>, vector<32x128xf32>
    %c0_5 = arith.constant 0 : index
    %c256 = arith.constant 256 : index
    %4 = vector.load %arg1[%c0_5, %c256] : memref<48x416xf32, #tpu.memory_space<vmem>>, vector<32x128xf32>
    %c0_6 = arith.constant 0 : index
    %c384 = arith.constant 384 : index
    %5 = vector.load %arg1[%c0_6, %c384] : memref<48x416xf32, #tpu.memory_space<vmem>>, vector<32x32xf32>
    %c32 = arith.constant 32 : index
    %c0_7 = arith.constant 0 : index
    %6 = vector.load %arg1[%c32, %c0_7] : memref<48x416xf32, #tpu.memory_space<vmem>>, vector<1x32xf32>
    %c33 = arith.constant 33 : index
    %c0_8 = arith.constant 0 : index
    %7 = vector.load %arg1[%c33, %c0_8] : memref<48x416xf32, #tpu.memory_space<vmem>>, vector<1x32xf32>
    %c34 = arith.constant 34 : index
    %c0_9 = arith.constant 0 : index
    %8 = vector.load %arg1[%c34, %c0_9] : memref<48x416xf32, #tpu.memory_space<vmem>>, vector<1x96xf32>
    %c35 = arith.constant 35 : index
    %c0_10 = arith.constant 0 : index
    %9 = vector.load %arg1[%c35, %c0_10] : memref<48x416xf32, #tpu.memory_space<vmem>>, vector<1x32xf32>
    %c36 = arith.constant 36 : index
    %c0_11 = arith.constant 0 : index
    %10 = vector.load %arg1[%c36, %c0_11] : memref<48x416xf32, #tpu.memory_space<vmem>>, vector<1x32xf32>
    %c37 = arith.constant 37 : index
    %c0_12 = arith.constant 0 : index
    %11 = vector.load %arg1[%c37, %c0_12] : memref<48x416xf32, #tpu.memory_space<vmem>>, vector<1x32xf32>
    %c38 = arith.constant 38 : index
    %c0_13 = arith.constant 0 : index
    %12 = vector.load %arg1[%c38, %c0_13] : memref<48x416xf32, #tpu.memory_space<vmem>>, vector<1x128xf32>
    %c39 = arith.constant 39 : index
    %c0_14 = arith.constant 0 : index
    %13 = vector.load %arg1[%c39, %c0_14] : memref<48x416xf32, #tpu.memory_space<vmem>>, vector<1x32xf32>
    %c40 = arith.constant 40 : index
    %c0_15 = arith.constant 0 : index
    %14 = vector.load %arg1[%c40, %c0_15] : memref<48x416xf32, #tpu.memory_space<vmem>>, vector<1x32xf32>
    %c41 = arith.constant 41 : index
    %c0_16 = arith.constant 0 : index
    %15 = vector.load %arg1[%c41, %c0_16] : memref<48x416xf32, #tpu.memory_space<vmem>>, vector<1x32xf32>
    %c42 = arith.constant 42 : index
    %c0_17 = arith.constant 0 : index
    %16 = vector.load %arg1[%c42, %c0_17] : memref<48x416xf32, #tpu.memory_space<vmem>>, vector<1x32xf32>
    %cst = arith.constant dense<0.000000e+00> : vector<16xf32>
    %17 = vector.multi_reduction <add>, %0, %cst [1] : vector<16x32xf32> to vector<16xf32>
    %18 = vector.shape_cast %17 : vector<16xf32> to vector<16x1xf32>
    %cst_18 = arith.constant 3.200000e+01 : f32
    %19 = vector.broadcast %cst_18 : f32 to vector<16x1xf32>
    %20 = arith.divf %18, %19 : vector<16x1xf32>
    %21 = vector.broadcast %20 : vector<16x1xf32> to vector<16x32xf32>
    %22 = arith.subf %0, %21 : vector<16x32xf32>
    %23 = arith.mulf %22, %22 : vector<16x32xf32>
    %cst_19 = arith.constant dense<0.000000e+00> : vector<16xf32>
    %24 = vector.multi_reduction <add>, %23, %cst_19 [1] : vector<16x32xf32> to vector<16xf32>
    %25 = vector.shape_cast %24 : vector<16xf32> to vector<16x1xf32>
    %cst_20 = arith.constant 3.200000e+01 : f32
    %26 = vector.broadcast %cst_20 : f32 to vector<16x1xf32>
    %27 = arith.divf %25, %26 : vector<16x1xf32>
    %28 = vector.broadcast %20 : vector<16x1xf32> to vector<16x32xf32>
    %29 = arith.subf %0, %28 : vector<16x32xf32>
    %cst_21 = arith.constant 9.99999974E-6 : f32
    %30 = vector.broadcast %cst_21 : f32 to vector<16x1xf32>
    %31 = arith.addf %27, %30 : vector<16x1xf32>
    %32 = math.rsqrt %31 : vector<16x1xf32>
    %33 = vector.broadcast %32 : vector<16x1xf32> to vector<16x32xf32>
    %34 = arith.mulf %29, %33 : vector<16x32xf32>
    %35 = vector.broadcast %6 : vector<1x32xf32> to vector<16x32xf32>
    %36 = arith.mulf %34, %35 : vector<16x32xf32>
    %37 = vector.broadcast %7 : vector<1x32xf32> to vector<16x32xf32>
    %38 = arith.addf %36, %37 : vector<16x32xf32>
    %cst_22 = arith.constant dense<0.000000e+00> : vector<16x96xf32>
    %39 = tpu.matmul %38, %1, %cst_22 {dimension_numbers = #tpu.dot_dimension_numbers<[1], [0], [0], [1], [0, 0, 1, 1], [], []>} : vector<16x32xf32>, vector<32x96xf32>, vector<16x96xf32> -> vector<16x96xf32>
    %40 = vector.broadcast %8 : vector<1x96xf32> to vector<16x96xf32>
    %41 = arith.addf %39, %40 : vector<16x96xf32>
    %42 = tpu.iota {dimensions = array<i32: 0>} : vector<16x16xi32>
    %43 = tpu.iota {dimensions = array<i32: 1>} : vector<16x16xi32>
    %false = arith.constant false
    %44 = vector.broadcast %false : i1 to vector<16x16xi1>
    %c0_i32 = arith.constant 0 : i32
    %45 = vector.broadcast %c0_i32 : i32 to vector<16x16xi32>
    %46 = arith.cmpi sge, %42, %45 : vector<16x16xi32>
    %c8_i32 = arith.constant 8 : i32
    %47 = vector.broadcast %c8_i32 : i32 to vector<16x16xi32>
    %48 = arith.cmpi slt, %42, %47 : vector<16x16xi32>
    %49 = arith.andi %46, %48 : vector<16x16xi1>
    %c0_i32_23 = arith.constant 0 : i32
    %50 = vector.broadcast %c0_i32_23 : i32 to vector<16x16xi32>
    %51 = arith.cmpi sge, %43, %50 : vector<16x16xi32>
    %c8_i32_24 = arith.constant 8 : i32
    %52 = vector.broadcast %c8_i32_24 : i32 to vector<16x16xi32>
    %53 = arith.cmpi slt, %43, %52 : vector<16x16xi32>
    %54 = arith.andi %51, %53 : vector<16x16xi1>
    %55 = arith.andi %49, %54 : vector<16x16xi1>
    %56 = arith.ori %44, %55 : vector<16x16xi1>
    %c8_i32_25 = arith.constant 8 : i32
    %57 = vector.broadcast %c8_i32_25 : i32 to vector<16x16xi32>
    %58 = arith.cmpi sge, %42, %57 : vector<16x16xi32>
    %c16_i32 = arith.constant 16 : i32
    %59 = vector.broadcast %c16_i32 : i32 to vector<16x16xi32>
    %60 = arith.cmpi slt, %42, %59 : vector<16x16xi32>
    %61 = arith.andi %58, %60 : vector<16x16xi1>
    %c8_i32_26 = arith.constant 8 : i32
    %62 = vector.broadcast %c8_i32_26 : i32 to vector<16x16xi32>
    %63 = arith.cmpi sge, %43, %62 : vector<16x16xi32>
    %c16_i32_27 = arith.constant 16 : i32
    %64 = vector.broadcast %c16_i32_27 : i32 to vector<16x16xi32>
    %65 = arith.cmpi slt, %43, %64 : vector<16x16xi32>
    %66 = arith.andi %63, %65 : vector<16x16xi1>
    %67 = arith.andi %61, %66 : vector<16x16xi1>
    %68 = arith.ori %56, %67 : vector<16x16xi1>
    %cst_28 = arith.constant 0.000000e+00 : f32
    %cst_29 = arith.constant -1.000000e+30 : f32
    %69 = vector.broadcast %cst_28 : f32 to vector<16x16xf32>
    %70 = vector.broadcast %cst_29 : f32 to vector<16x16xf32>
    %71 = arith.select %68, %69, %70 : vector<16x16xi1>, vector<16x16xf32>
    %72 = vector.extract_strided_slice %41 {offsets = [0, 0], sizes = [16, 8], strides = [1, 1]} : vector<16x96xf32> to vector<16x8xf32>
    %73 = vector.extract_strided_slice %41 {offsets = [0, 32], sizes = [16, 8], strides = [1, 1]} : vector<16x96xf32> to vector<16x8xf32>
    %74 = vector.extract_strided_slice %41 {offsets = [0, 64], sizes = [16, 8], strides = [1, 1]} : vector<16x96xf32> to vector<16x8xf32>
    %cst_30 = arith.constant dense<0.000000e+00> : vector<16x16xf32>
    %75 = tpu.matmul %72, %73, %cst_30 {dimension_numbers = #tpu.dot_dimension_numbers<[1], [1], [0], [0], [0, 0, 1, 0], [], []>} : vector<16x8xf32>, vector<16x8xf32>, vector<16x16xf32> -> vector<16x16xf32>
    %76 = arith.addf %75, %71 : vector<16x16xf32>
    %cst_31 = arith.constant dense<0xFF800000> : vector<16xf32>
    %77 = vector.multi_reduction <maximumf>, %76, %cst_31 [1] : vector<16x16xf32> to vector<16xf32>
    %78 = vector.shape_cast %77 : vector<16xf32> to vector<16x1xf32>
    %79 = vector.broadcast %78 : vector<16x1xf32> to vector<16x16xf32>
    %80 = arith.subf %76, %79 : vector<16x16xf32>
    %81 = math.exp %80 : vector<16x16xf32>
    %cst_32 = arith.constant dense<0.000000e+00> : vector<16xf32>
    %82 = vector.multi_reduction <add>, %81, %cst_32 [1] : vector<16x16xf32> to vector<16xf32>
    %83 = vector.shape_cast %82 : vector<16xf32> to vector<16x1xf32>
    %84 = tpu.reciprocal %83 : vector<16x1xf32> -> vector<16x1xf32>
    %85 = vector.broadcast %84 : vector<16x1xf32> to vector<16x16xf32>
    %86 = arith.mulf %81, %85 : vector<16x16xf32>
    %cst_33 = arith.constant dense<0.000000e+00> : vector<16x8xf32>
    %87 = tpu.matmul %86, %74, %cst_33 {dimension_numbers = #tpu.dot_dimension_numbers<[1], [0], [0], [1], [0, 0, 1, 1], [], []>} : vector<16x16xf32>, vector<16x8xf32>, vector<16x8xf32> -> vector<16x8xf32>
    %88 = vector.extract_strided_slice %41 {offsets = [0, 8], sizes = [16, 8], strides = [1, 1]} : vector<16x96xf32> to vector<16x8xf32>
    %89 = vector.extract_strided_slice %41 {offsets = [0, 40], sizes = [16, 8], strides = [1, 1]} : vector<16x96xf32> to vector<16x8xf32>
    %90 = vector.extract_strided_slice %41 {offsets = [0, 72], sizes = [16, 8], strides = [1, 1]} : vector<16x96xf32> to vector<16x8xf32>
    %cst_34 = arith.constant dense<0.000000e+00> : vector<16x16xf32>
    %91 = tpu.matmul %88, %89, %cst_34 {dimension_numbers = #tpu.dot_dimension_numbers<[1], [1], [0], [0], [0, 0, 1, 0], [], []>} : vector<16x8xf32>, vector<16x8xf32>, vector<16x16xf32> -> vector<16x16xf32>
    %92 = arith.addf %91, %71 : vector<16x16xf32>
    %cst_35 = arith.constant dense<0xFF800000> : vector<16xf32>
    %93 = vector.multi_reduction <maximumf>, %92, %cst_35 [1] : vector<16x16xf32> to vector<16xf32>
    %94 = vector.shape_cast %93 : vector<16xf32> to vector<16x1xf32>
    %95 = vector.broadcast %94 : vector<16x1xf32> to vector<16x16xf32>
    %96 = arith.subf %92, %95 : vector<16x16xf32>
    %97 = math.exp %96 : vector<16x16xf32>
    %cst_36 = arith.constant dense<0.000000e+00> : vector<16xf32>
    %98 = vector.multi_reduction <add>, %97, %cst_36 [1] : vector<16x16xf32> to vector<16xf32>
    %99 = vector.shape_cast %98 : vector<16xf32> to vector<16x1xf32>
    %100 = tpu.reciprocal %99 : vector<16x1xf32> -> vector<16x1xf32>
    %101 = vector.broadcast %100 : vector<16x1xf32> to vector<16x16xf32>
    %102 = arith.mulf %97, %101 : vector<16x16xf32>
    %cst_37 = arith.constant dense<0.000000e+00> : vector<16x8xf32>
    %103 = tpu.matmul %102, %90, %cst_37 {dimension_numbers = #tpu.dot_dimension_numbers<[1], [0], [0], [1], [0, 0, 1, 1], [], []>} : vector<16x16xf32>, vector<16x8xf32>, vector<16x8xf32> -> vector<16x8xf32>
    %104 = vector.extract_strided_slice %41 {offsets = [0, 16], sizes = [16, 8], strides = [1, 1]} : vector<16x96xf32> to vector<16x8xf32>
    %105 = vector.extract_strided_slice %41 {offsets = [0, 48], sizes = [16, 8], strides = [1, 1]} : vector<16x96xf32> to vector<16x8xf32>
    %106 = vector.extract_strided_slice %41 {offsets = [0, 80], sizes = [16, 8], strides = [1, 1]} : vector<16x96xf32> to vector<16x8xf32>
    %cst_38 = arith.constant dense<0.000000e+00> : vector<16x16xf32>
    %107 = tpu.matmul %104, %105, %cst_38 {dimension_numbers = #tpu.dot_dimension_numbers<[1], [1], [0], [0], [0, 0, 1, 0], [], []>} : vector<16x8xf32>, vector<16x8xf32>, vector<16x16xf32> -> vector<16x16xf32>
    %108 = arith.addf %107, %71 : vector<16x16xf32>
    %cst_39 = arith.constant dense<0xFF800000> : vector<16xf32>
    %109 = vector.multi_reduction <maximumf>, %108, %cst_39 [1] : vector<16x16xf32> to vector<16xf32>
    %110 = vector.shape_cast %109 : vector<16xf32> to vector<16x1xf32>
    %111 = vector.broadcast %110 : vector<16x1xf32> to vector<16x16xf32>
    %112 = arith.subf %108, %111 : vector<16x16xf32>
    %113 = math.exp %112 : vector<16x16xf32>
    %cst_40 = arith.constant dense<0.000000e+00> : vector<16xf32>
    %114 = vector.multi_reduction <add>, %113, %cst_40 [1] : vector<16x16xf32> to vector<16xf32>
    %115 = vector.shape_cast %114 : vector<16xf32> to vector<16x1xf32>
    %116 = tpu.reciprocal %115 : vector<16x1xf32> -> vector<16x1xf32>
    %117 = vector.broadcast %116 : vector<16x1xf32> to vector<16x16xf32>
    %118 = arith.mulf %113, %117 : vector<16x16xf32>
    %cst_41 = arith.constant dense<0.000000e+00> : vector<16x8xf32>
    %119 = tpu.matmul %118, %106, %cst_41 {dimension_numbers = #tpu.dot_dimension_numbers<[1], [0], [0], [1], [0, 0, 1, 1], [], []>} : vector<16x16xf32>, vector<16x8xf32>, vector<16x8xf32> -> vector<16x8xf32>
    %120 = vector.extract_strided_slice %41 {offsets = [0, 24], sizes = [16, 8], strides = [1, 1]} : vector<16x96xf32> to vector<16x8xf32>
    %121 = vector.extract_strided_slice %41 {offsets = [0, 56], sizes = [16, 8], strides = [1, 1]} : vector<16x96xf32> to vector<16x8xf32>
    %122 = vector.extract_strided_slice %41 {offsets = [0, 88], sizes = [16, 8], strides = [1, 1]} : vector<16x96xf32> to vector<16x8xf32>
    %cst_42 = arith.constant dense<0.000000e+00> : vector<16x16xf32>
    %123 = tpu.matmul %120, %121, %cst_42 {dimension_numbers = #tpu.dot_dimension_numbers<[1], [1], [0], [0], [0, 0, 1, 0], [], []>} : vector<16x8xf32>, vector<16x8xf32>, vector<16x16xf32> -> vector<16x16xf32>
    %124 = arith.addf %123, %71 : vector<16x16xf32>
    %cst_43 = arith.constant dense<0xFF800000> : vector<16xf32>
    %125 = vector.multi_reduction <maximumf>, %124, %cst_43 [1] : vector<16x16xf32> to vector<16xf32>
    %126 = vector.shape_cast %125 : vector<16xf32> to vector<16x1xf32>
    %127 = vector.broadcast %126 : vector<16x1xf32> to vector<16x16xf32>
    %128 = arith.subf %124, %127 : vector<16x16xf32>
    %129 = math.exp %128 : vector<16x16xf32>
    %cst_44 = arith.constant dense<0.000000e+00> : vector<16xf32>
    %130 = vector.multi_reduction <add>, %129, %cst_44 [1] : vector<16x16xf32> to vector<16xf32>
    %131 = vector.shape_cast %130 : vector<16xf32> to vector<16x1xf32>
    %132 = tpu.reciprocal %131 : vector<16x1xf32> -> vector<16x1xf32>
    %133 = vector.broadcast %132 : vector<16x1xf32> to vector<16x16xf32>
    %134 = arith.mulf %129, %133 : vector<16x16xf32>
    %cst_45 = arith.constant dense<0.000000e+00> : vector<16x8xf32>
    %135 = tpu.matmul %134, %122, %cst_45 {dimension_numbers = #tpu.dot_dimension_numbers<[1], [0], [0], [1], [0, 0, 1, 1], [], []>} : vector<16x16xf32>, vector<16x8xf32>, vector<16x8xf32> -> vector<16x8xf32>
    %136 = tpu.concatenate %87, %103, %119, %135 in 1 : vector<16x8xf32>, vector<16x8xf32>, vector<16x8xf32>, vector<16x8xf32> -> vector<16x32xf32>
    %cst_46 = arith.constant dense<0.000000e+00> : vector<16x32xf32>
    %137 = tpu.matmul %136, %2, %cst_46 {dimension_numbers = #tpu.dot_dimension_numbers<[1], [0], [0], [1], [0, 0, 1, 1], [], []>} : vector<16x32xf32>, vector<32x32xf32>, vector<16x32xf32> -> vector<16x32xf32>
    %138 = vector.broadcast %9 : vector<1x32xf32> to vector<16x32xf32>
    %139 = arith.addf %137, %138 : vector<16x32xf32>
    %140 = arith.addf %0, %139 : vector<16x32xf32>
    %cst_47 = arith.constant dense<0.000000e+00> : vector<16xf32>
    %141 = vector.multi_reduction <add>, %140, %cst_47 [1] : vector<16x32xf32> to vector<16xf32>
    %142 = vector.shape_cast %141 : vector<16xf32> to vector<16x1xf32>
    %cst_48 = arith.constant 3.200000e+01 : f32
    %143 = vector.broadcast %cst_48 : f32 to vector<16x1xf32>
    %144 = arith.divf %142, %143 : vector<16x1xf32>
    %145 = vector.broadcast %144 : vector<16x1xf32> to vector<16x32xf32>
    %146 = arith.subf %140, %145 : vector<16x32xf32>
    %147 = arith.mulf %146, %146 : vector<16x32xf32>
    %cst_49 = arith.constant dense<0.000000e+00> : vector<16xf32>
    %148 = vector.multi_reduction <add>, %147, %cst_49 [1] : vector<16x32xf32> to vector<16xf32>
    %149 = vector.shape_cast %148 : vector<16xf32> to vector<16x1xf32>
    %cst_50 = arith.constant 3.200000e+01 : f32
    %150 = vector.broadcast %cst_50 : f32 to vector<16x1xf32>
    %151 = arith.divf %149, %150 : vector<16x1xf32>
    %152 = vector.broadcast %144 : vector<16x1xf32> to vector<16x32xf32>
    %153 = arith.subf %140, %152 : vector<16x32xf32>
    %cst_51 = arith.constant 9.99999974E-6 : f32
    %154 = vector.broadcast %cst_51 : f32 to vector<16x1xf32>
    %155 = arith.addf %151, %154 : vector<16x1xf32>
    %156 = math.rsqrt %155 : vector<16x1xf32>
    %157 = vector.broadcast %156 : vector<16x1xf32> to vector<16x32xf32>
    %158 = arith.mulf %153, %157 : vector<16x32xf32>
    %159 = vector.broadcast %10 : vector<1x32xf32> to vector<16x32xf32>
    %160 = arith.mulf %158, %159 : vector<16x32xf32>
    %161 = vector.broadcast %11 : vector<1x32xf32> to vector<16x32xf32>
    %162 = arith.addf %160, %161 : vector<16x32xf32>
    %cst_52 = arith.constant dense<0.000000e+00> : vector<16x128xf32>
    %163 = tpu.matmul %162, %3, %cst_52 {dimension_numbers = #tpu.dot_dimension_numbers<[1], [0], [0], [1], [0, 0, 1, 1], [], []>} : vector<16x32xf32>, vector<32x128xf32>, vector<16x128xf32> -> vector<16x128xf32>
    %164 = vector.broadcast %12 : vector<1x128xf32> to vector<16x128xf32>
    %165 = arith.addf %163, %164 : vector<16x128xf32>
    %cst_53 = arith.constant 5.000000e-01 : f32
    %166 = vector.broadcast %cst_53 : f32 to vector<16x128xf32>
    %167 = arith.mulf %166, %165 : vector<16x128xf32>
    %cst_54 = arith.constant 0.707106769 : f32
    %168 = vector.broadcast %cst_54 : f32 to vector<16x128xf32>
    %169 = arith.mulf %165, %168 : vector<16x128xf32>
    %170 = math.erf %169 : vector<16x128xf32>
    %cst_55 = arith.constant 1.000000e+00 : f32
    %171 = vector.broadcast %cst_55 : f32 to vector<16x128xf32>
    %172 = arith.addf %171, %170 : vector<16x128xf32>
    %173 = arith.mulf %167, %172 : vector<16x128xf32>
    %cst_56 = arith.constant dense<0.000000e+00> : vector<16x32xf32>
    %174 = tpu.matmul %173, %4, %cst_56 {dimension_numbers = #tpu.dot_dimension_numbers<[1], [1], [0], [0], [0, 0, 1, 0], [], []>} : vector<16x128xf32>, vector<32x128xf32>, vector<16x32xf32> -> vector<16x32xf32>
    %175 = vector.broadcast %13 : vector<1x32xf32> to vector<16x32xf32>
    %176 = arith.addf %174, %175 : vector<16x32xf32>
    %177 = arith.addf %140, %176 : vector<16x32xf32>
    %cst_57 = arith.constant dense<0.000000e+00> : vector<16x32xf32>
    %178 = tpu.matmul %177, %5, %cst_57 {dimension_numbers = #tpu.dot_dimension_numbers<[1], [0], [0], [1], [0, 0, 1, 1], [], []>} : vector<16x32xf32>, vector<32x32xf32>, vector<16x32xf32> -> vector<16x32xf32>
    %179 = vector.broadcast %14 : vector<1x32xf32> to vector<16x32xf32>
    %180 = arith.addf %178, %179 : vector<16x32xf32>
    %cst_58 = arith.constant dense<0.000000e+00> : vector<16xf32>
    %181 = vector.multi_reduction <add>, %180, %cst_58 [1] : vector<16x32xf32> to vector<16xf32>
    %182 = vector.shape_cast %181 : vector<16xf32> to vector<16x1xf32>
    %cst_59 = arith.constant 3.200000e+01 : f32
    %183 = vector.broadcast %cst_59 : f32 to vector<16x1xf32>
    %184 = arith.divf %182, %183 : vector<16x1xf32>
    %185 = vector.broadcast %184 : vector<16x1xf32> to vector<16x32xf32>
    %186 = arith.subf %180, %185 : vector<16x32xf32>
    %187 = arith.mulf %186, %186 : vector<16x32xf32>
    %cst_60 = arith.constant dense<0.000000e+00> : vector<16xf32>
    %188 = vector.multi_reduction <add>, %187, %cst_60 [1] : vector<16x32xf32> to vector<16xf32>
    %189 = vector.shape_cast %188 : vector<16xf32> to vector<16x1xf32>
    %cst_61 = arith.constant 3.200000e+01 : f32
    %190 = vector.broadcast %cst_61 : f32 to vector<16x1xf32>
    %191 = arith.divf %189, %190 : vector<16x1xf32>
    %192 = vector.broadcast %184 : vector<16x1xf32> to vector<16x32xf32>
    %193 = arith.subf %180, %192 : vector<16x32xf32>
    %cst_62 = arith.constant 9.99999974E-6 : f32
    %194 = vector.broadcast %cst_62 : f32 to vector<16x1xf32>
    %195 = arith.addf %191, %194 : vector<16x1xf32>
    %196 = math.rsqrt %195 : vector<16x1xf32>
    %197 = vector.broadcast %196 : vector<16x1xf32> to vector<16x32xf32>
    %198 = arith.mulf %193, %197 : vector<16x32xf32>
    %199 = vector.broadcast %15 : vector<1x32xf32> to vector<16x32xf32>
    %200 = arith.mulf %198, %199 : vector<16x32xf32>
    %201 = vector.broadcast %16 : vector<1x32xf32> to vector<16x32xf32>
    %202 = arith.addf %200, %201 : vector<16x32xf32>
    %203 = tpu.concatenate %177, %202 in 0 : vector<16x32xf32>, vector<16x32xf32> -> vector<32x32xf32>
    %c0_63 = arith.constant 0 : index
    %c0_64 = arith.constant 0 : index
    %204 = vector.load %arg2[%c0_63, %c0_64] : memref<32x32xf32, #tpu.memory_space<vmem>>, vector<32x32xf32>
    tpu.vector_store %arg2[%c0_63, %c0_64], %203 {strides = array<i32>} : memref<32x32xf32, #tpu.memory_space<vmem>>, vector<32x32xf32>,
    return
  }
}

</mosaic_0001>

<bundles_post_ra>
// kernel: tpu_custom_call.1
= control target key start
LH: loop header
LB: loop body
LE: loop exit
PB: predicated region body
PF: predicated region fallthrough
CT: control target
= control target key end

     0   :  { %7 = vsyncpa [#allocation3], 0  ;;  %s2199_s0 = inlined_call_operand.hbm [shape: f32[16,32], index: 0, kind: input, shape index: {}]   ;;  %s2200_s1 = inlined_call_operand.hbm [shape: f32[48,416], index: 1, kind: input, shape index: {}]   ;;  %s2201_s2 = inlined_call_operand.hbm [shape: f32[32,32], index: 2, kind: output, shape index: {}]  }
   0x1   :  { %8 = vsyncpa [#allocation6], 0 }
   0x2   :  { %9 = vsyncpa [#allocation4], 0  ;;  %s1950_s9 = smov [#allocation2]   ;;  %s1878_s13 = scalar_lea.hbm %s2199_s0, 256 }
   0x3   :  { %s15_s10 = sshll.u32 %s1950_s9, 4  ;;  %p1879_p0 = scmp.ne.s32.totalorder %s2199_s0, %s1878_s13  ;;  %s16_s10 = int_to_ptr.vmem [resolvable:$true] %s15_s10 }
   0x4   :  { %p1882_p1 = scmp.lt.u32.totalorder %s1878_s13, %s2199_s0 }
   0x6   :  { %p1884_p2 = pnand %p1882_p1, %p1879_p0 }
   0x8   :  { %1887 = shalt.err (!%p1884_p2)
}
   0x9   :  { %s1888_s18 = scalar_lea.vmem %s16_s10, 256  ;;  %p1893_p4 = scmp.lt.s32.totalorder %s16_s10, %s16_s10 }
   0xa   :  { %p1889_p3 = scmp.ne.s32.totalorder %s16_s10, %s1888_s18  ;;  %p1894_p5 = scmp.lt.s32.totalorder %s1888_s18, %s1888_s18 }
   0xc   :  { %p1895_p6 = por %p1894_p5, %p1893_p4 }
   0xe   :  { %p1896_p7 = pnand %p1895_p6, %p1889_p3 }
  0x10   :  { %1899 = shalt.err (!%p1896_p7)
}
  0x11   :  { %s1951_s19 = smov 128   ;;  %s1952_s20 = smov 8  }
  0x12   :  { %21 = dma.hbm_to_vmem [thread:$0]  %s2199_s0, 256, %s16_s10, [#allocation3], %s1951_s19, %s1951_s19, %s1952_s20  }
  0x13   :  { %s1953_s23 = smov [#allocation5]   ;;  %s1900_s27 = scalar_lea.hbm %s2200_s1, 3072 }
  0x14   :  { %s27_s24 = sshll.u32 %s1953_s23, 4  ;;  %p1901_p8 = scmp.ne.s32.totalorder %s2200_s1, %s1900_s27  ;;  %s28_s24 = int_to_ptr.vmem [resolvable:$true] %s27_s24 }
  0x15   :  { %p1904_p9 = scmp.lt.u32.totalorder %s1900_s27, %s2200_s1 }
  0x17   :  { %p1906_p10 = pnand %p1904_p9, %p1901_p8 }
  0x19   :  { %1909 = shalt.err (!%p1906_p10)
}
  0x1a   :  { %s1910_s4 = scalar_lea.vmem %s28_s24, 3072  ;;  %p1915_p12 = scmp.lt.s32.totalorder %s28_s24, %s28_s24 }
  0x1b   :  { %p1911_p11 = scmp.ne.s32.totalorder %s28_s24, %s1910_s4  ;;  %p1916_p13 = scmp.lt.s32.totalorder %s1910_s4, %s1910_s4 }
  0x1d   :  { %p1917_p0 = por %p1916_p13, %p1915_p12 }
  0x1f   :  { %p1918_p1 = pnand %p1917_p0, %p1911_p11 }
  0x21   :  { %1921 = shalt.err (!%p1918_p1)
}
  0x22   :  { %s1954_s0 = smov 512   ;;  %s1955_s5 = smov 32  }
  0x23   :  { %33 = dma.hbm_to_vmem [thread:$0]  %s2200_s1, 3072, %s28_s24, [#allocation6], %s1954_s0, %s1954_s0, %s1955_s5  }
  0x24   :  { %1944 = dma.done.wait [#allocation3], 256  }
  0x25   :  { %1945 = vsyncadd [#allocation3], 4294967040 }
  0x26   :  { %1946 = dma.done.wait [#allocation6], 3072  }
  0x27   :  { %1947 = vsyncadd [#allocation6], 4294964224  ;;  %vm69_vm0 = vcmask 261120   ;;  %v2014_v0 = vld [vmem:[#allocation2] sm:$0xff]  ;;  %v2016_v1 = vld [vmem:[#allocation2 + $0x8] sm:$0xff]  ;;  %vm219_vm1 = vcmask 64512   ;;  %v185_v47 = vlaneseq }
  0x28   :  { %v70_v2 = vsel %vm69_vm0, %v2014_v0, 0.0  ;;  %v73_v3 = vsel %vm69_vm0, %v2016_v1, 0.0  ;;  %v2026_v14 = vld [vmem:[#allocation5] sm:$0xff]  ;;  %s1956_s1 = smov 96   ;;  %s1957_s8 = smov 88   ;;  %vm2056_vm2 = vmpackc.low %vm219_vm1, %vm219_vm1  ;;  %vm303_vm7 = vcmask 130048  }
  0x29   :  { %71 = vadd.xlane.f32.xlu0 %v70_v2  ;;  %v2028_v15 = vld [vmem:[#allocation5 + $0x20] sm:$0xff]  ;;  %s1958_s9 = smov 120   ;;  %v186_v48 = vand.u32 127, %v185_v47  ;;  %v1959_v49 = vmov -1e+30   ;;  %s1960_s10 = smov 64  }
  0x2a   :  { %v2030_v16 = vld [vmem:[#allocation5 + $0x40] sm:$0xff]  ;;  %v1679_v17 = vpack.c.bf16 %v2028_v15, %v2026_v14  ;;  %s1961_s11 = smov 56   ;;  %s1962_s12 = smov 112   ;;  %vm1041_vm8 = vcmask 195584  }
  0x2b   :  { %v2034_v18 = vld [vmem:[#allocation5 + $0x60] sm:$0xff]  ;;  %vm204_vm3 = vcmp.ge.s32.totalorder %v186_v48, 8  ;;  %vm205_vm4 = vcmp.lt.s32.totalorder %v186_v48, 16  ;;  %vm194_vm5 = vcmp.lt.s32.totalorder %v186_v48, 8  ;;  %s1963_s13 = smov 80   ;;  %s1964_s14 = smov 48  }
  0x2c   :  { %v1683_v19 = vpack.c.bf16 %v2034_v18, %v2030_v16  ;;  %1680 = vmatprep.subr.bf16.mxu0 %v1679_v17  ;;  %v58_v27 = vld [vmem:[#allocation5 + $0x80] ss:$0 sm:$0xff]  ;;  %v59_v29 = vld [vmem:[#allocation5 + $0x81] ss:$0 sm:$0xff]  ;;  %v60_v36 = vld [vmem:[#allocation5 + $0x82] ss:$0 sm:$0xff]  ;;  %v1825_v45 = vpack.i.bf16 %v2034_v18, %v2030_v16 }
  0x2d   :  { %74 = vadd.xlane.f32.xlu0 %v73_v3  ;;  %1682 = vmatpush3.bf16.msra.mxu0 %v1679_v17  ;;  %vm206_vm6 = vmand %vm204_vm3, %vm205_vm4  ;;  %v2066_v50 = vsel %vm194_vm5, 0.0, %v1959_v49  ;;  %s1965_s15 = smov 104   ;;  %s1966_s16 = smov 72  }
  0x2e   :  { %1684 = vmatprep.subr.bf16.mxu0 %v1683_v19  ;;  %v2068_v52 = vsel %vm206_vm6, 0.0, %v1959_v49  ;;  %s1967_s17 = smov 40   ;;  %s1968_s18 = smov 16  }
  0x2f   :  { %s1969_s21 = smov 24   ;;  %s1970_s22 = smov [#allocation7]  }
  0x30   :  { %s1461_s23 = sshll.u32 %s1970_s22, 4  ;;  %s1462_s23 = int_to_ptr.vmem [resolvable:$true] %s1461_s23 }
  0x31   :  { %1686 = vmatpush3.bf16.msra.mxu0 %v1683_v19  ;;  %s1922_s24 = scalar_lea.vmem %s1462_s23, 512  ;;  %p1927_p3 = scmp.lt.s32.totalorder %s1462_s23, %s1462_s23 }
  0x32   :  { %p1923_p2 = scmp.ne.s32.totalorder %s1462_s23, %s1922_s24  ;;  %p1928_p4 = scmp.lt.s32.totalorder %s1922_s24, %s1922_s24 }
  0x34   :  { %p1929_p5 = por %p1928_p4, %p1927_p3 }
  0x36   :  { %p1930_p6 = pnand %p1929_p5, %p1923_p2 }
  0xb6   :  { %v72_v4 = vpop.xlane.xlu0 %71 }
  0xb7   :  { %v77_v5 = vmul.f32 0.03125, %v72_v4 }
  0xb9   :  { %v79_v6 = vsub.f32 %v2014_v0, %v77_v5 }
  0xba   :  { %v75_v7 = vpop.xlane.xlu0 %74 }
  0xbb   :  { %v78_v8 = vmul.f32 0.03125, %v75_v7  ;;  %v81_v9 = vmul.f32 %v79_v6, %v79_v6 }
  0xbd   :  { %v80_v10 = vsub.f32 %v2016_v1, %v78_v8  ;;  %v83_v11 = vsel %vm69_vm0, %v81_v9, 0.0 }
  0xbe   :  { %84 = vadd.xlane.f32.xlu1 %v83_v11 }
  0xbf   :  { %v82_v12 = vmul.f32 %v80_v10, %v80_v10 }
  0xc1   :  { %v86_v13 = vsel %vm69_vm0, %v82_v12, 0.0 }
  0xc2   :  { %87 = vadd.xlane.f32.xlu1 %v86_v13 }
 0x14b   :  { %v85_v20 = vpop.xlane.xlu1 %84 }
 0x14c   :  { %v89_v21 = vmul.f32 0.03125, %v85_v20 }
 0x14e   :  { %v91_v22 = vadd.f32 1e-05, %v89_v21 }
 0x14f   :  { %v88_v23 = vpop.xlane.xlu1 %87 }
 0x150   :  { %1830 = vrsqrt.f32 %v91_v22  ;;  %v90_v24 = vmul.f32 0.03125, %v88_v23 }
 0x152   :  { %v92_v25 = vadd.f32 1e-05, %v90_v24 }
 0x154   :  { %1832 = vrsqrt.f32 %v92_v25 }
 0x15a   :  { %v1831_v26 = vpop.eup %1830 }
 0x15b   :  { %v95_v28 = vmul.f32 %v1831_v26, %v79_v6 }
 0x15d   :  { %v97_v30 = vmul.f32 %v95_v28, %v58_v27 }
 0x15e   :  { %v1833_v31 = vpop.eup %1832 }
 0x15f   :  { %v96_v32 = vmul.f32 %v1833_v31, %v80_v10  ;;  %v99_v33 = vadd.f32 %v97_v30, %v59_v29 }
 0x161   :  { %v98_v34 = vmul.f32 %v96_v32, %v58_v27  ;;  %1576 = vmatprep.mubr.msk.f32.mxu0 %vm69_vm0, %v99_v33 }
 0x163   :  { %v100_v35 = vadd.f32 %v98_v34, %v59_v29 }
 0x165   :  { %1577 = vmatmul.mubr.msk.f32.vlgmr.msra.gmra.mrb[0].mxu0 %vm69_vm0, %v100_v35 }
 0x238   :  { %v1578_v37 = vpop.f32.mrb[0].mxu0 }
 0x239   :  { %v2040_v38 = vadd.f32 %v1578_v37, %v60_v36  ;;  %v173_v39 = vpop.f32.mrb[1].mxu0 }
 0x23a   :  { %v2042_v40 = vadd.f32 %v173_v39, %v60_v36 }
 0x23c   :  { %1583 = vmatprep.mubr.msk.f32.mxu1 %vm219_vm1, %v2042_v40  ;;  %v2048_v41 = vpack.i.bf16 %v2040_v38, %v2042_v40 }
 0x23e   :  { %1781 = vrot.lane.b32.xlu0 %v2048_v41, %s1956_s1 }
 0x242   :  { %1791 = vrot.lane.b32.xlu0 %v2048_v41, %s1957_s8 }
 0x246   :  { %413 = vrot.lane.b32.xlu0 %v2042_v40, %s1958_s9 }
 0x24a   :  { %415 = vrot.lane.b32.xlu0 %v2040_v38, %s1958_s9 }
 0x2b0   :  { %v1782_v42 = vpop.permute.xlu0 %1781 }
 0x2b1   :  { %v1784_v43 = vunpack.i.h.bf16 %v1782_v42  ;;  %v1783_v44 = vunpack.i.l.bf16 %v1782_v42 }
 0x2b3   :  { %v1687_v46 = vpack.c.bf16 %v1784_v43, %v1783_v44 }
 0x2b4   :  { %v1792_v8 = vpop.permute.xlu0 %1791 }
 0x2b5   :  { %1689 = vmatprep.subr.msk.bf16.mxu1 %vm2056_vm2, %v1687_v46  ;;  %v1794_v10 = vunpack.i.h.bf16 %v1792_v8  ;;  %v1793_v11 = vunpack.i.l.bf16 %v1792_v8 }
 0x2b6   :  { %1692 = vmatpush3.bf16.xpose.msk.msra.mxu1 %vm2056_vm2, %v1687_v46 }
 0x2b7   :  { %v1697_v19 = vpack.c.bf16 %v1794_v10, %v1793_v11 }
 0x2b8   :  { %v414_v24 = vpop.permute.xlu0 %413 }
 0x2bc   :  { %v416_v25 = vpop.permute.xlu0 %415 }
 0x2bd   :  { %1584 = vmatmul.mubr.msk.f32.vlgmr.msra.gmra.mrb[0].mxu1 %vm219_vm1, %v2040_v38 }
 0x390   :  { %v1585_v51 = vpop.f32.mrb[0].mxu1 }
 0x391   :  { %v294_v53 = vpop.f32.mrb[1].mxu1  ;;  %v300_v55 = vadd.f32 %v1585_v51, %v2068_v52 }
 0x392   :  { %v295_v54 = vadd.f32 %v294_v53, %v2066_v50 }
 0x393   :  { %v307_v57 = vsel %vm303_vm7, %v300_v55, -inf }
 0x394   :  { %v304_v56 = vsel %vm303_vm7, %v295_v54, -inf }
 0x395   :  { %305 = vmax.xlane.f32.xlu1 %v304_v56 }
 0x399   :  { %308 = vmax.xlane.f32.xlu1 %v307_v57 }
 0x422   :  { %v306_v58 = vpop.xlane.xlu1 %305 }
 0x423   :  { %v310_v59 = vsub.f32 %v295_v54, %v306_v58 }
 0x425   :  { %v312_v62 = vmul.f32 1.442695, %v310_v59 }
 0x426   :  { %v309_v60 = vpop.xlane.xlu1 %308 }
 0x427   :  { %v311_v61 = vsub.f32 %v300_v55, %v309_v60 }
 0x429   :  { %v314_v63 = vmul.f32 1.442695, %v311_v61 }
 0x42b   :  { %1834 = vpow2.f32 %v314_v63 }
 0x42c   :  { %1836 = vpow2.f32 %v312_v62 }
 0x435   :  { %v1835_v2 = vpop.eup %1834 }
 0x436   :  { %v319_v3 = vsel %vm303_vm7, %v1835_v2, 0.0  ;;  %v1837_v4 = vpop.eup %1836 }
 0x437   :  { %320 = vadd.xlane.f32.xlu1 %v319_v3  ;;  %v316_v5 = vsel %vm303_vm7, %v1837_v4, 0.0 }
 0x43b   :  { %317 = vadd.xlane.f32.xlu1 %v316_v5 }
 0x44c   :  { %1786 = vrot.lane.b32.xlu1 %v2048_v41, %s1960_s10 }
 0x4c4   :  { %v321_v6 = vpop.xlane.xlu1 %320 }
 0x4c5   :  { %1838 = vrcp.f32 %v321_v6 }
 0x4c8   :  { %v318_v7 = vpop.xlane.xlu1 %317 }
 0x4c9   :  { %1840 = vrcp.f32 %v318_v7 }
 0x4cc   :  { %v1787_v9 = vpop.permute.xlu1 %1786 }
 0x4cd   :  { %v1789_v12 = vunpack.i.h.bf16 %v1787_v9  ;;  %v1788_v13 = vunpack.i.l.bf16 %v1787_v9 }
 0x4cf   :  { %v1693_v17 = vpack.c.bf16 %v1789_v12, %v1788_v13  ;;  %v1839_v20 = vpop.eup %1838 }
 0x4d0   :  { %v325_v23 = vmul.f32 %v1839_v20, %v1835_v2 }
 0x4d1   :  { %1694 = vmatprep.subr.bf16.mxu1 %v1693_v17 }
 0x4d2   :  { %1696 = vmatpush3.bf16.msra.mxu1 %v1693_v17 }
 0x4d3   :  { %v1841_v21 = vpop.eup %1840  ;;  %1699 = vmatprep.subr.msk.bf16.mxu1 %vm2056_vm2, %v1697_v19 }
 0x4d4   :  { %v324_v22 = vmul.f32 %v1841_v21, %v1837_v4 }
 0x4d6   :  { %1590 = vmatprep.mubr.msk.f32.mxu1 %vm303_vm7, %v324_v22 }
 0x4d7   :  { %1591 = vmatmul.mubr.msk.f32.vlgmr.msra.gmra.mrb[2].mxu1 %vm303_vm7, %v325_v23 }
 0x4d8   :  { %1597 = vmatprep.mubr.msk.f32.mxu1 %vm219_vm1, %v414_v24 }
 0x4db   :  { %1702 = vmatpush3.bf16.xpose.msk.msra.mxu1 %vm2056_vm2, %v1697_v19 }
 0x4e2   :  { %1598 = vmatmul.mubr.msk.f32.vlgmr.msra.gmra.mrb[4].mxu1 %vm219_vm1, %v416_v25 }
 0x5aa   :  { %v2085_v26 = vpop.f32.mrb[2].mxu1 }
 0x5ab   :  { %v2087_v27 = vpop.f32.mrb[3].mxu1 }
 0x5b5   :  { %v1599_v28 = vpop.f32.mrb[4].mxu1 }
 0x5b6   :  { %v501_v29 = vadd.f32 %v1599_v28, %v2068_v52  ;;  %v495_v30 = vpop.f32.mrb[5].mxu1 }
 0x5b7   :  { %v496_v31 = vadd.f32 %v495_v30, %v2066_v50 }
 0x5b8   :  { %v507_v32 = vsel %vm303_vm7, %v501_v29, -inf }
 0x5b9   :  { %508 = vmax.xlane.f32.xlu0 %v507_v32  ;;  %v504_v33 = vsel %vm303_vm7, %v496_v31, -inf }
 0x5ba   :  { %505 = vmax.xlane.f32.xlu1 %v504_v33 }
 0x5cb   :  { %1796 = vrot.lane.b32.xlu1 %v2048_v41, %s1961_s11 }
 0x5cf   :  { %613 = vrot.lane.b32.xlu1 %v2042_v40, %s1962_s12 }
 0x5d3   :  { %615 = vrot.lane.b32.xlu1 %v2040_v38, %s1962_s12 }
 0x646   :  { %v509_v34 = vpop.xlane.xlu0 %508 }
 0x647   :  { %v511_v35 = vsub.f32 %v501_v29, %v509_v34  ;;  %v506_v36 = vpop.xlane.xlu1 %505 }
 0x648   :  { %v510_v37 = vsub.f32 %v496_v31, %v506_v36 }
 0x649   :  { %v514_v39 = vmul.f32 1.442695, %v511_v35 }
 0x64a   :  { %v512_v42 = vmul.f32 1.442695, %v510_v37 }
 0x64b   :  { %1842 = vpow2.f32 %v514_v39  ;;  %v1797_v43 = vpop.permute.xlu1 %1796 }
 0x64c   :  { %v1799_v44 = vunpack.i.h.bf16 %v1797_v43  ;;  %v1798_v46 = vunpack.i.l.bf16 %v1797_v43  ;;  %1844 = vpow2.f32 %v512_v42 }
 0x64e   :  { %v1703_v47 = vpack.c.bf16 %v1799_v44, %v1798_v46 }
 0x64f   :  { %v614_v2 = vpop.permute.xlu1 %613 }
 0x650   :  { %1704 = vmatprep.subr.bf16.mxu0 %v1703_v47 }
 0x651   :  { %1706 = vmatpush3.bf16.msra.mxu0 %v1703_v47 }
 0x653   :  { %v616_v3 = vpop.permute.xlu1 %615 }
 0x655   :  { %v1843_v48 = vpop.eup %1842 }
 0x656   :  { %v519_v49 = vsel %vm303_vm7, %v1843_v48, 0.0  ;;  %v1845_v51 = vpop.eup %1844 }
 0x657   :  { %520 = vadd.xlane.f32.xlu0 %v519_v49  ;;  %v516_v53 = vsel %vm303_vm7, %v1845_v51, 0.0 }
 0x65b   :  { %517 = vadd.xlane.f32.xlu0 %v516_v53 }
 0x671   :  { %1801 = vrot.lane.b32.xlu0 %v2048_v41, %s1963_s13 }
 0x6e4   :  { %v521_v54 = vpop.xlane.xlu0 %520 }
 0x6e5   :  { %1846 = vrcp.f32 %v521_v54 }
 0x6e8   :  { %v518_v55 = vpop.xlane.xlu0 %517 }
 0x6e9   :  { %1848 = vrcp.f32 %v518_v55 }
 0x6ec   :  { %v1802_v56 = vpop.permute.xlu0 %1801 }
 0x6ed   :  { %v1804_v57 = vunpack.i.h.bf16 %v1802_v56  ;;  %v1803_v58 = vunpack.i.l.bf16 %v1802_v56 }
 0x6ef   :  { %v1707_v59 = vpack.c.bf16 %v1804_v57, %v1803_v58  ;;  %v1847_v60 = vpop.eup %1846 }
 0x6f0   :  { %v525_v63 = vmul.f32 %v1847_v60, %v1843_v48 }
 0x6f1   :  { %1709 = vmatprep.subr.msk.bf16.mxu0 %vm2056_vm2, %v1707_v59 }
 0x6f3   :  { %v1849_v61 = vpop.eup %1848 }
 0x6f4   :  { %v524_v62 = vmul.f32 %v1849_v61, %v1845_v51 }
 0x6f6   :  { %1604 = vmatprep.mubr.msk.f32.mxu0 %vm303_vm7, %v524_v62 }
 0x6f7   :  { %1605 = vmatmul.mubr.msk.f32.vlgmr.msra.gmra.mrb[2].mxu0 %vm303_vm7, %v525_v63 }
 0x6f8   :  { %1712 = vmatpush3.bf16.xpose.msk.msra.mxu0 %vm2056_vm2, %v1707_v59  ;;  %1611 = vmatprep.mubr.msk.f32.mxu0 %vm219_vm1, %v614_v2 }
 0x6ff   :  { %1612 = vmatmul.mubr.msk.f32.vlgmr.msra.gmra.mrb[4].mxu0 %vm219_vm1, %v616_v3  ;;  %v1820_v3 = vpack.i.bf16 %v2028_v15, %v2026_v14 }
 0x7ca   :  { %v2107_v4 = vpop.f32.mrb[2].mxu0 }
 0x7cb   :  { %v2109_v5 = vpop.f32.mrb[3].mxu0 }
 0x7d2   :  { %v1613_v6 = vpop.f32.mrb[4].mxu0 }
 0x7d3   :  { %v701_v7 = vadd.f32 %v1613_v6, %v2068_v52  ;;  %v695_v8 = vpop.f32.mrb[5].mxu0 }
 0x7d4   :  { %v696_v9 = vadd.f32 %v695_v8, %v2066_v50 }
 0x7d5   :  { %v707_v10 = vsel %vm303_vm7, %v701_v7, -inf }
 0x7d6   :  { %708 = vmax.xlane.f32.xlu0 %v707_v10  ;;  %v704_v11 = vsel %vm303_vm7, %v696_v9, -inf }
 0x7d7   :  { %705 = vmax.xlane.f32.xlu1 %v704_v11 }
 0x7e8   :  { %1806 = vrot.lane.b32.xlu1 %v2048_v41, %s1964_s14 }
 0x7ec   :  { %813 = vrot.lane.b32.xlu1 %v2042_v40, %s1965_s15 }
 0x7f0   :  { %815 = vrot.lane.b32.xlu1 %v2040_v38, %s1965_s15 }
 0x863   :  { %v709_v12 = vpop.xlane.xlu0 %708 }
 0x864   :  { %v711_v13 = vsub.f32 %v701_v7, %v709_v12  ;;  %v706_v17 = vpop.xlane.xlu1 %705 }
 0x865   :  { %v710_v19 = vsub.f32 %v696_v9, %v706_v17 }
 0x866   :  { %v714_v20 = vmul.f32 1.442695, %v711_v13 }
 0x867   :  { %v712_v21 = vmul.f32 1.442695, %v710_v19 }
 0x868   :  { %1850 = vpow2.f32 %v714_v20  ;;  %v1807_v22 = vpop.permute.xlu1 %1806 }
 0x869   :  { %v1809_v23 = vunpack.i.h.bf16 %v1807_v22  ;;  %v1808_v24 = vunpack.i.l.bf16 %v1807_v22  ;;  %1852 = vpow2.f32 %v712_v21 }
 0x86b   :  { %v1713_v25 = vpack.c.bf16 %v1809_v23, %v1808_v24 }
 0x86c   :  { %v814_v43 = vpop.permute.xlu1 %813 }
 0x86d   :  { %1714 = vmatprep.subr.bf16.mxu1 %v1713_v25 }
 0x86e   :  { %1716 = vmatpush3.bf16.msra.mxu1 %v1713_v25 }
 0x870   :  { %v816_v44 = vpop.permute.xlu1 %815 }
 0x872   :  { %v1851_v28 = vpop.eup %1850 }
 0x873   :  { %v719_v29 = vsel %vm303_vm7, %v1851_v28, 0.0  ;;  %v1853_v40 = vpop.eup %1852 }
 0x874   :  { %720 = vadd.xlane.f32.xlu0 %v719_v29  ;;  %v716_v38 = vsel %vm303_vm7, %v1853_v40, 0.0 }
 0x878   :  { %717 = vadd.xlane.f32.xlu0 %v716_v38 }
 0x88e   :  { %1811 = vrot.lane.b32.xlu0 %v2048_v41, %s1966_s16 }
 0x901   :  { %v721_v30 = vpop.xlane.xlu0 %720 }
 0x902   :  { %1854 = vrcp.f32 %v721_v30 }
 0x905   :  { %v718_v31 = vpop.xlane.xlu0 %717 }
 0x906   :  { %1856 = vrcp.f32 %v718_v31 }
 0x909   :  { %v1812_v32 = vpop.permute.xlu0 %1811 }
 0x90a   :  { %v1814_v33 = vunpack.i.h.bf16 %v1812_v32  ;;  %v1813_v34 = vunpack.i.l.bf16 %v1812_v32 }
 0x90c   :  { %v1717_v35 = vpack.c.bf16 %v1814_v33, %v1813_v34  ;;  %v1855_v36 = vpop.eup %1854  ;;  %v61_v34 = vld [vmem:[#allocation5 + $0x83] ss:$0 sm:$0xff] }
 0x90d   :  { %v725_v42 = vmul.f32 %v1855_v36, %v1851_v28 }
 0x90e   :  { %1719 = vmatprep.subr.msk.bf16.mxu1 %vm2056_vm2, %v1717_v35 }
 0x910   :  { %v1857_v37 = vpop.eup %1856 }
 0x911   :  { %v724_v39 = vmul.f32 %v1857_v37, %v1853_v40 }
 0x913   :  { %1618 = vmatprep.mubr.msk.f32.mxu1 %vm303_vm7, %v724_v39 }
 0x914   :  { %1619 = vmatmul.mubr.msk.f32.vlgmr.msra.gmra.mrb[6].mxu1 %vm303_vm7, %v725_v42 }
 0x915   :  { %1722 = vmatpush3.bf16.xpose.msk.msra.mxu1 %vm2056_vm2, %v1717_v35  ;;  %1625 = vmatprep.mubr.msk.f32.mxu1 %vm219_vm1, %v814_v43 }
 0x91c   :  { %1626 = vmatmul.mubr.msk.f32.vlgmr.msra.gmra.mrb[8].mxu1 %vm219_vm1, %v816_v44 }
 0x9e7   :  { %v1620_v46 = vpop.f32.mrb[6].mxu1 }
 0x9e8   :  { %v804_v47 = vpop.f32.mrb[7].mxu1 }
 0x9ef   :  { %v1627_v48 = vpop.f32.mrb[8].mxu1 }
 0x9f0   :  { %v901_v49 = vadd.f32 %v1627_v48, %v2068_v52  ;;  %v895_v51 = vpop.f32.mrb[9].mxu1 }
 0x9f1   :  { %v896_v53 = vadd.f32 %v895_v51, %v2066_v50 }
 0x9f2   :  { %v907_v54 = vsel %vm303_vm7, %v901_v49, -inf }
 0x9f3   :  { %908 = vmax.xlane.f32.xlu0 %v907_v54  ;;  %v904_v55 = vsel %vm303_vm7, %v896_v53, -inf }
 0x9f4   :  { %905 = vmax.xlane.f32.xlu1 %v904_v55  ;;  %v46_v55 = vld [vmem:[#allocation5 + $0x8] sm:$0xff] }
 0xa05   :  { %1816 = vrot.lane.b32.xlu1 %v2048_v41, %s1967_s17 }
 0xa09   :  { %1826 = vrot.lane.b32.xlu1 %v1825_v45, %s1955_s5  ;;  %v47_v45 = vld [vmem:[#allocation5 + $0x28] sm:$0xff] }
 0xa0d   :  { %1015 = vrot.lane.b32.xlu1 %v2109_v5, %s1952_s20 }
 0xa11   :  { %1017 = vrot.lane.b32.xlu1 %v2107_v4, %s1952_s20 }
 0xa15   :  { %1025 = vrot.lane.b32.xlu1 %v1620_v46, %s1968_s18 }
 0xa80   :  { %v909_v50 = vpop.xlane.xlu0 %908 }
 0xa81   :  { %v911_v52 = vsub.f32 %v901_v49, %v909_v50  ;;  %v906_v56 = vpop.xlane.xlu1 %905  ;;  %v1735_v50 = vpack.c.bf16 %v47_v45, %v46_v55 }
 0xa82   :  { %v910_v57 = vsub.f32 %v896_v53, %v906_v56  ;;  %v49_v56 = vld [vmem:[#allocation5 + $0x68] sm:$0xff] }
 0xa83   :  { %v914_v58 = vmul.f32 1.442695, %v911_v52  ;;  %1736 = vmatprep.subr.bf16.mxu1 %v1735_v50  ;;  %v48_v52 = vld [vmem:[#allocation5 + $0x48] sm:$0xff] }
 0xa84   :  { %v912_v59 = vmul.f32 1.442695, %v910_v57  ;;  %1738 = vmatpush3.bf16.msra.mxu1 %v1735_v50  ;;  %v1739_v57 = vpack.c.bf16 %v49_v56, %v48_v52 }
 0xa85   :  { %v1817_v41 = vpop.permute.xlu1 %1816 }
 0xa86   :  { %1858 = vpow2.f32 %v912_v59  ;;  %v1819_v60 = vunpack.i.h.bf16 %v1817_v41  ;;  %v1818_v16 = vunpack.i.l.bf16 %v1817_v41  ;;  %1740 = vmatprep.subr.bf16.mxu1 %v1739_v57 }
 0xa87   :  { %1860 = vpow2.f32 %v914_v58 }
 0xa88   :  { %v1723_v18 = vpack.c.bf16 %v1819_v60, %v1818_v16  ;;  %1742 = vmatpush3.bf16.msra.mxu1 %v1739_v57 }
 0xa89   :  { %v1827_v10 = vpop.permute.xlu1 %1826 }
 0xa8a   :  { %1724 = vmatprep.subr.bf16.mxu0 %v1723_v18  ;;  %v1829_v12 = vunpack.i.h.bf16 %v1827_v10  ;;  %v1828_v13 = vunpack.i.l.bf16 %v1827_v10  ;;  %v51_v10 = vld [vmem:[#allocation5 + $0x30] sm:$0xff] }
 0xa8b   :  { %1726 = vmatpush3.bf16.msra.mxu0 %v1723_v18 }
 0xa8c   :  { %v1731_v15 = vpack.c.bf16 %v1829_v12, %v1828_v13  ;;  %v52_v12 = vld [vmem:[#allocation5 + $0x50] sm:$0xff] }
 0xa8d   :  { %v1016_v22 = vpop.permute.xlu1 %1015  ;;  %v53_v13 = vld [vmem:[#allocation5 + $0x70] sm:$0xff] }
 0xa8e   :  { %v1037_v28 = vsel %vm219_vm1, %v2087_v27, %v1016_v22 }
 0xa90   :  { %v1859_v61 = vpop.eup %1858 }
 0xa91   :  { %v916_v62 = vsel %vm303_vm7, %v1859_v61, 0.0  ;;  %v1861_v63 = vpop.eup %1860  ;;  %v1018_v23 = vpop.permute.xlu1 %1017 }
 0xa92   :  { %917 = vadd.xlane.f32.xlu0 %v916_v62  ;;  %v919_v2 = vsel %vm303_vm7, %v1861_v63, 0.0  ;;  %v1038_v40 = vsel %vm219_vm1, %v2085_v26, %v1018_v23  ;;  %v62_v62 = vld [vmem:[#allocation5 + $0x84] ss:$0 sm:$0xff] }
 0xa95   :  { %v1026_v24 = vpop.permute.xlu1 %1025 }
 0xa96   :  { %920 = vadd.xlane.f32.xlu0 %v919_v2  ;;  %v1040_v31 = vsel %vm303_vm7, %v1038_v40, %v1026_v24  ;;  %v63_v2 = vld [vmem:[#allocation5 + $0x85] ss:$0 sm:$0xff] }
 0xaac   :  { %1821 = vrot.lane.b32.xlu0 %v1820_v3, %s1955_s5 }
 0xab0   :  { %1023 = vrot.lane.b32.xlu0 %v804_v47, %s1968_s18 }
 0xb1f   :  { %v918_v4 = vpop.xlane.xlu0 %917 }
 0xb20   :  { %1862 = vrcp.f32 %v918_v4 }
 0xb23   :  { %v921_v5 = vpop.xlane.xlu0 %920 }
 0xb24   :  { %1864 = vrcp.f32 %v921_v5 }
 0xb27   :  { %v1822_v6 = vpop.permute.xlu0 %1821 }
 0xb28   :  { %v1824_v7 = vunpack.i.h.bf16 %v1822_v6  ;;  %v1823_v8 = vunpack.i.l.bf16 %v1822_v6 }
 0xb2a   :  { %v1863_v9 = vpop.eup %1862  ;;  %v1727_v11 = vpack.c.bf16 %v1824_v7, %v1823_v8 }
 0xb2b   :  { %v924_v17 = vmul.f32 %v1863_v9, %v1859_v61  ;;  %v1024_v25 = vpop.permute.xlu0 %1023  ;;  %v50_v9 = vld [vmem:[#allocation5 + $0x10] sm:$0xff] }
 0xb2c   :  { %1728 = vmatprep.subr.bf16.mxu0 %v1727_v11  ;;  %v1039_v38 = vsel %vm303_vm7, %v1037_v28, %v1024_v25 }
 0xb2d   :  { %1632 = vmatprep.mubr.msk.f32.mxu0 %vm303_vm7, %v924_v17  ;;  %v1747_v17 = vpack.c.bf16 %v53_v13, %v52_v12 }
 0xb2e   :  { %v1865_v14 = vpop.eup %1864 }
 0xb2f   :  { %v925_v19 = vmul.f32 %v1865_v14, %v1861_v63  ;;  %v54_v14 = vld [vmem:[#allocation5 + $0x18] sm:$0xff] }
 0xb31   :  { %1633 = vmatmul.mubr.msk.f32.vlgmr.msra.gmra.mrb[6].mxu0 %vm303_vm7, %v925_v19 }
 0xb32   :  { %1730 = vmatpush3.bf16.msra.mxu0 %v1727_v11  ;;  %v1743_v11 = vpack.c.bf16 %v51_v10, %v50_v9 }
 0xb33   :  { %1732 = vmatprep.subr.bf16.mxu0 %v1731_v15 }
 0xb36   :  { %1734 = vmatpush3.bf16.msra.mxu0 %v1731_v15  ;;  %v55_v15 = vld [vmem:[#allocation5 + $0x38] sm:$0xff] }
 0xb37   :  { %1744 = vmatprep.subr.bf16.mxu0 %v1743_v11  ;;  %v1751_v19 = vpack.c.bf16 %v55_v15, %v54_v14 }
 0xb39   :  { %1752 = vmatprep.subr.bf16.mxu1 %v1751_v19 }
 0xc04   :  { %v1634_v20 = vpop.f32.mrb[6].mxu0 }
 0xc05   :  { %1033 = vrot.lane.b32.xlu1 %v1634_v20, %s1969_s21  ;;  %v1004_v21 = vpop.f32.mrb[7].mxu0  ;;  %v64_v20 = vld [vmem:[#allocation5 + $0x86] ss:$0 sm:$0xff] }
 0xc06   :  { %1031 = vrot.lane.b32.xlu0 %v1004_v21, %s1969_s21 }
 0xc77   :  { %v1034_v29 = vpop.permute.xlu1 %1033 }
 0xc78   :  { %v1032_v30 = vpop.permute.xlu0 %1031  ;;  %v1043_v33 = vsel %vm1041_vm8, %v1040_v31, %v1034_v29 }
 0xc79   :  { %v1042_v32 = vsel %vm1041_vm8, %v1039_v38, %v1032_v30 }
 0xc7a   :  { %1643 = vmatprep.mubr.msk.f32.mxu0 %vm69_vm0, %v1042_v32 }
 0xc7b   :  { %1644 = vmatmul.mubr.msk.f32.vlgmr.msra.gmra.mrb[8].mxu0 %vm69_vm0, %v1043_v33 }
 0xc7c   :  { %1746 = vmatpush3.bf16.xpose.msra.mxu0 %v1743_v11 }
 0xc7d   :  { %1748 = vmatprep.subr.bf16.mxu0 %v1747_v17 }
 0xc84   :  { %1750 = vmatpush3.bf16.xpose.msra.mxu0 %v1747_v17 }
 0xd4e   :  { %v1645_v35 = vpop.f32.mrb[8].mxu0 }
 0xd4f   :  { %v1138_v36 = vadd.f32 %v1645_v35, %v61_v34  ;;  %v1132_v37 = vpop.f32.mrb[9].mxu0  ;;  %v56_v35 = vld [vmem:[#allocation5 + $0x58] sm:$0xff] }
 0xd50   :  { %v1133_v27 = vadd.f32 %v1132_v37, %v61_v34 }
 0xd51   :  { %v2157_v39 = vadd.f32 %v1138_v36, %v2016_v1  ;;  %v57_v36 = vld [vmem:[#allocation5 + $0x78] sm:$0xff] }
 0xd52   :  { %v2160_v26 = vadd.f32 %v1133_v27, %v2014_v0  ;;  %v1755_v37 = vpack.c.bf16 %v57_v36, %v56_v35  ;;  %v65_v27 = vld [vmem:[#allocation5 + $0x87] ss:$0 sm:$0xff] }
 0xd53   :  { %v1146_v42 = vsel %vm69_vm0, %v2157_v39, 0.0 }
 0xd54   :  { %1147 = vadd.xlane.f32.xlu1 %v1146_v42  ;;  %v1143_v43 = vsel %vm69_vm0, %v2160_v26, 0.0 }
 0xd55   :  { %1144 = vadd.xlane.f32.xlu0 %v1143_v43 }
 0xde1   :  { %v1148_v44 = vpop.xlane.xlu1 %1147 }
 0xde2   :  { %v1150_v46 = vmul.f32 0.03125, %v1148_v44  ;;  %v1145_v47 = vpop.xlane.xlu0 %1144 }
 0xde3   :  { %v1149_v48 = vmul.f32 0.03125, %v1145_v47 }
 0xde4   :  { %v1152_v49 = vsub.f32 %v2157_v39, %v1150_v46 }
 0xde5   :  { %v1151_v1 = vsub.f32 %v2160_v26, %v1149_v48 }
 0xde6   :  { %v1154_v53 = vmul.f32 %v1152_v49, %v1152_v49 }
 0xde7   :  { %v1153_v51 = vmul.f32 %v1151_v1, %v1151_v1 }
 0xde8   :  { %v1158_v54 = vsel %vm69_vm0, %v1154_v53, 0.0 }
 0xde9   :  { %v1155_v0 = vsel %vm69_vm0, %v1153_v51, 0.0 }
 0xdea   :  { %1156 = vadd.xlane.f32.xlu0 %v1155_v0 }
 0xdee   :  { %1159 = vadd.xlane.f32.xlu0 %v1158_v54 }
 0xe77   :  { %v1157_v58 = vpop.xlane.xlu0 %1156 }
 0xe78   :  { %v1161_v59 = vmul.f32 0.03125, %v1157_v58 }
 0xe7a   :  { %v1163_v41 = vadd.f32 1e-05, %v1161_v59 }
 0xe7b   :  { %v1160_v60 = vpop.xlane.xlu0 %1159 }
 0xe7c   :  { %1866 = vrsqrt.f32 %v1163_v41  ;;  %v1162_v16 = vmul.f32 0.03125, %v1160_v60 }
 0xe7e   :  { %v1164_v18 = vadd.f32 1e-05, %v1162_v16 }
 0xe80   :  { %1868 = vrsqrt.f32 %v1164_v18 }
 0xe86   :  { %v1867_v61 = vpop.eup %1866 }
 0xe87   :  { %v1167_v63 = vmul.f32 %v1867_v61, %v1151_v1 }
 0xe89   :  { %v1169_v3 = vmul.f32 %v1167_v63, %v62_v62 }
 0xe8a   :  { %v1869_v4 = vpop.eup %1868 }
 0xe8b   :  { %v1168_v5 = vmul.f32 %v1869_v4, %v1152_v49  ;;  %v1171_v6 = vadd.f32 %v1169_v3, %v63_v2  ;;  %v66_v49 = vld [vmem:[#allocation5 + $0xa0] ss:$0 sm:$0xff]  ;;  %v67_v3 = vld [vmem:[#allocation5 + $0xa1] ss:$0 sm:$0xff] }
 0xe8d   :  { %v1170_v7 = vmul.f32 %v1168_v5, %v62_v62  ;;  %1654 = vmatprep.mubr.msk.f32.mxu1 %vm69_vm0, %v1171_v6 }
 0xe8f   :  { %v1172_v8 = vadd.f32 %v1170_v7, %v63_v2  ;;  %v68_v7 = vld [vmem:[#allocation5 + $0xa2] ss:$0 sm:$0xff] }
 0xe91   :  { %1655 = vmatmul.mubr.msk.f32.vlgmr.msra.gmra.mrb[10].mxu1 %vm69_vm0, %v1172_v8 }
 0xe92   :  { %1754 = vmatpush3.bf16.msra.mxu1 %v1751_v19 }
 0xe93   :  { %1756 = vmatprep.subr.bf16.mxu1 %v1755_v37 }
 0xe96   :  { %1758 = vmatpush3.bf16.msra.mxu1 %v1755_v37 }
 0xf64   :  { %v1656_v21 = vpop.f32.mrb[10].mxu1 }
 0xf65   :  { %v1251_v22 = vadd.f32 %v1656_v21, %v64_v20  ;;  %v1245_v23 = vpop.f32.mrb[11].mxu1 }
 0xf66   :  { %v1246_v24 = vadd.f32 %v1245_v23, %v64_v20 }
 0xf67   :  { %v1257_v25 = vmul.f32 0.70710677, %v1251_v22  ;;  %v1255_v32 = vmul.f32 0.5, %v1251_v22 }
 0xf68   :  { %v1256_v28 = vmul.f32 0.70710677, %v1246_v24  ;;  %v1254_v30 = vmul.f32 0.5, %v1246_v24 }
 0xf69   :  { %1870 = verf.f32 %v1257_v25 }
 0xf6a   :  { %1872 = verf.f32 %v1256_v28 }
 0xf73   :  { %v1871_v29 = vpop.eup %1870 }
 0xf74   :  { %v1873_v40 = vpop.eup %1872  ;;  %v1261_v38 = vadd.f32 1.0, %v1871_v29 }
 0xf75   :  { %v1260_v31 = vadd.f32 1.0, %v1873_v40 }
 0xf76   :  { %v1263_v34 = vmul.f32 %v1261_v38, %v1255_v32 }
 0xf77   :  { %v1262_v33 = vmul.f32 %v1260_v31, %v1254_v30 }
 0xf79   :  { %1665 = vmatprep.mubr.f32.mxu0 %v1262_v33 }
 0xf7a   :  { %1666 = vmatmul.mubr.f32.vlgmr.msra.gmra.mrb[10].mxu0 %v1263_v34 }
0x104d   :  { %v1667_v42 = vpop.f32.mrb[10].mxu0 }
0x104e   :  { %v1336_v43 = vadd.f32 %v1667_v42, %v65_v27  ;;  %v1330_v44 = vpop.f32.mrb[11].mxu0 }
0x104f   :  { %v1331_v46 = vadd.f32 %v1330_v44, %v65_v27 }
0x1050   :  { %v1340_v47 = vadd.f32 %v1336_v43, %v2157_v39 }
0x1051   :  { %v1339_v48 = vadd.f32 %v1331_v46, %v2160_v26 }
0x1052   :  { %1453 = vst.msk [vmem:[#allocation7 + $0x8] sm:$0xff] %vm69_vm0, %v1340_v47 }
0x1053   :  { %1452 = vst.msk [vmem:[#allocation7] sm:$0xff] %vm69_vm0, %v1339_v48  ;;  %1676 = vmatprep.mubr.msk.f32.mxu1 %vm69_vm0, %v1339_v48 }
0x1054   :  { %1677 = vmatmul.mubr.msk.f32.vlgmr.msra.gmra.mrb[12].mxu1 %vm69_vm0, %v1340_v47 }
0x1127   :  { %v1678_v1 = vpop.f32.mrb[12].mxu1 }
0x1128   :  { %v1419_v51 = vadd.f32 %v1678_v1, %v66_v49  ;;  %v1413_v0 = vpop.f32.mrb[13].mxu1 }
0x1129   :  { %v1414_v53 = vadd.f32 %v1413_v0, %v66_v49 }
0x112a   :  { %v1425_v54 = vsel %vm69_vm0, %v1419_v51, 0.0 }
0x112b   :  { %1426 = vadd.xlane.f32.xlu1 %v1425_v54  ;;  %v1422_v39 = vsel %vm69_vm0, %v1414_v53, 0.0 }
0x112c   :  { %1423 = vadd.xlane.f32.xlu0 %v1422_v39 }
0x11b8   :  { %v1427_v26 = vpop.xlane.xlu1 %1426 }
0x11b9   :  { %v1429_v55 = vmul.f32 0.03125, %v1427_v26  ;;  %v1424_v45 = vpop.xlane.xlu0 %1423 }
0x11ba   :  { %v1428_v50 = vmul.f32 0.03125, %v1424_v45 }
0x11bb   :  { %v1431_v52 = vsub.f32 %v1419_v51, %v1429_v55 }
0x11bc   :  { %v1430_v56 = vsub.f32 %v1414_v53, %v1428_v50 }
0x11bd   :  { %v1433_v57 = vmul.f32 %v1431_v52, %v1431_v52 }
0x11be   :  { %v1432_v58 = vmul.f32 %v1430_v56, %v1430_v56 }
0x11bf   :  { %v1437_v59 = vsel %vm69_vm0, %v1433_v57, 0.0 }
0x11c0   :  { %1438 = vadd.xlane.f32.xlu1 %v1437_v59  ;;  %v1434_v41 = vsel %vm69_vm0, %v1432_v58, 0.0 }
0x11c1   :  { %1435 = vadd.xlane.f32.xlu0 %v1434_v41 }
0x124d   :  { %v1439_v60 = vpop.xlane.xlu1 %1438 }
0x124e   :  { %v1441_v16 = vmul.f32 0.03125, %v1439_v60  ;;  %v1436_v18 = vpop.xlane.xlu0 %1435 }
0x124f   :  { %v1440_v61 = vmul.f32 0.03125, %v1436_v18 }
0x1250   :  { %v1443_v62 = vadd.f32 1e-05, %v1441_v16 }
0x1251   :  { %v1442_v63 = vadd.f32 1e-05, %v1440_v61 }
0x1252   :  { %1874 = vrsqrt.f32 %v1443_v62 }
0x1253   :  { %1876 = vrsqrt.f32 %v1442_v63 }
0x125c   :  { %v1875_v2 = vpop.eup %1874 }
0x125d   :  { %v1877_v4 = vpop.eup %1876  ;;  %v1447_v5 = vmul.f32 %v1875_v2, %v1431_v52 }
0x125e   :  { %v1446_v6 = vmul.f32 %v1877_v4, %v1430_v56 }
0x125f   :  { %v1449_v8 = vmul.f32 %v1447_v5, %v67_v3 }
0x1260   :  { %v1448_v9 = vmul.f32 %v1446_v6, %v67_v3 }
0x1261   :  { %v1451_v10 = vadd.f32 %v1449_v8, %v68_v7 }
0x1262   :  { %v1450_v11 = vadd.f32 %v1448_v9, %v68_v7 }
0x1263   :  { %1455 = vst.msk [vmem:[#allocation7 + $0x18] sm:$0xff] %vm69_vm0, %v1451_v10 }
0x1264   :  { %1454 = vst.msk [vmem:[#allocation7 + $0x10] sm:$0xff] %vm69_vm0, %v1450_v11 }
0x1265   :  { %1933 = shalt.err (!%p1930_p6)
}
0x1266   :  { %s1934_s27 = scalar_lea.hbm %s2201_s2, 512 }
0x1267   :  { %p1935_p7 = scmp.ne.s32.totalorder %s2201_s2, %s1934_s27  ;;  %p1938_p8 = scmp.lt.u32.totalorder %s1934_s27, %s2201_s2 }
0x1269   :  { %p1940_p9 = pnand %p1938_p8, %p1935_p7 }
0x126b   :  { %1943 = shalt.err (!%p1940_p9)
}
0x126c   :  { %1467 = dma.vmem_to_hbm [thread:$0]  %s1462_s23, 512, %s2201_s2, [#allocation4], %s1951_s19, %s1951_s19, %s1952_s20  }
0x126d   :  { %1948 = dma.done.wait [#allocation4], 512  }
0x126e   :  { %1949 = vsyncadd [#allocation4], 4294966784 }
0x126f   :  { %1471 = vsyncpa [#allocation3], 1 }
0x1270   :  { %1472 = vsyncpa [#allocation6], 1 }
0x1271   :  { %1473 = vsyncpa [#allocation4], 1 }

</bundles_post_ra>
